<compile_context>
chip_gen: v7x
topology: tpu7x:2x2x1
jax: 0.10.0
libtpu: 0.0.40
codegen_flags: <defaults>
</compile_context>

<pallas_src>
import jax
import jax.numpy as jnp
from jax import lax
from jax.experimental import pallas as pl
from jax.experimental.pallas import tpu as pltpu


def mlp_kernel(x_ref, w0_ref, b0_ref, w1_ref, b1_ref, wf_ref, bf_ref, out_ref):
    # x_ref : (TB, 115) f32   -- raw feature tile, streamed over the batch grid
    # w0_ref: (115, 64) bf16  -- VMEM resident (constant index_map)
    # b0_ref: (1, 64)   f32
    # w1_ref: (64, 32)  bf16
    # b1_ref: (1, 32)   f32
    # wf_ref: (8, 32)   bf16  -- row 0 is the final weight row, rows 1..7 are zero
    # bf_ref: (1, 1)    f32
    # out_ref: (1, TB)  f32   -- lane-dense sigmoid outputs for this batch tile

    # fc0 + bias + ReLU: bf16 x bf16 MXU matmul (ragged K=115 is masked by Mosaic),
    # f32 accumulation; bias add stays f32.
    x = x_ref[...].astype(jnp.bfloat16)
    h = jnp.dot(x, w0_ref[...], preferred_element_type=jnp.float32)
    h = jnp.maximum(h + b0_ref[...], 0.0)                              # (TB, 64) f32

    # fc1 + bias + ReLU (bf16 operands, f32 accumulate).
    h = jnp.dot(h.astype(jnp.bfloat16), w1_ref[...],
                preferred_element_type=jnp.float32) + b1_ref[...]
    h = jnp.maximum(h, 0.0).astype(jnp.bfloat16)                       # (TB, 32) bf16

    # final_fc: contract the 32 features with the batch landing on the lane axis so the
    # result is already lane-dense; lhs is sublane-padded to 8 rows (rows 1..7 zero).
    logits8 = lax.dot_general(wf_ref[...], h, (((1,), (1,)), ((), ())),
                              preferred_element_type=jnp.float32)      # (8, TB)
    logits = logits8[0:1, :] + bf_ref[...]                             # (1, TB)

    # Exact sigmoid epilogue (exp on the EUP, one f32 divide) -> outputs strictly in [0,1].
    out_ref[...] = 1.0 / (1.0 + jnp.exp(-logits))


def binary_classifier_forward(x, params, *, block_b=8192,
                              vmem_limit_bytes=40 * 1024 * 1024):
    """Fused forward pass.  x: (B, 115) f32 -> (B, 1) f32 probabilities."""
    B, n_in = x.shape
    w0, b0 = params["w0"], params["b0"]          # (115, 64), (1, 64)
    w1, b1 = params["w1"], params["b1"]          # (64, 32),  (1, 32)
    wf, bf = params["wf"], params["bf"]          # (32, 1),   (1, 1)
    h0, h1 = w0.shape[1], w1.shape[1]

    assert block_b % 128 == 0, "block_b must be a multiple of 128 (lane-dense output tile)"
    # Don't over-pad tiny batches: shrink the tile to the 128-aligned batch size.
    block_b = min(block_b, ((B + 127) // 128) * 128)

    B_pad = ((B + block_b - 1) // block_b) * block_b
    x_in = x if B_pad == B else jnp.pad(x, ((0, B_pad - B), (0, 0)))

    # One-time weight prep (tiny): bf16 matmul operands, f32 biases.
    w0_b = w0.astype(jnp.bfloat16)                                      # (115, 64)
    w1_b = w1.astype(jnp.bfloat16)                                      # (64, 32)
    wf8 = jnp.concatenate([wf.reshape(1, h1),
                           jnp.zeros((7, h1), wf.dtype)],
                          axis=0).astype(jnp.bfloat16)                  # (8, 32)

    grid = (B_pad // block_b,)
    out = pl.pallas_call(
        mlp_kernel,
        out_shape=jax.ShapeDtypeStruct((1, B_pad), jnp.float32),
        grid_spec=pltpu.PrefetchScalarGridSpec(
            num_scalar_prefetch=0,
            grid=grid,
            in_specs=[
                # x: streamed over the batch grid (auto double-buffered DMA).  Last block
                # dim == full feature dim (115), so no HBM-side repacking of x is needed.
                pl.BlockSpec((block_b, n_in), lambda i: (i, 0)),
                # weights / biases: constant index_map -> stay resident in VMEM.
                pl.BlockSpec((n_in, h0), lambda i: (0, 0)),
                pl.BlockSpec((1, h0), lambda i: (0, 0)),
                pl.BlockSpec((h0, h1), lambda i: (0, 0)),
                pl.BlockSpec((1, h1), lambda i: (0, 0)),
                pl.BlockSpec((8, h1), lambda i: (0, 0)),
                pl.BlockSpec((1, 1), lambda i: (0, 0)),
            ],
            out_specs=pl.BlockSpec((1, block_b), lambda i: (0, i)),
        ),
        compiler_params=pltpu.CompilerParams(
            dimension_semantics=("parallel",),   # v7x: both TensorCores take batch tiles
            vmem_limit_bytes=vmem_limit_bytes,
        ),
    )(x_in, w0_b,
      b0.reshape(1, h0).astype(jnp.float32),
      w1_b,
      b1.reshape(1, h1).astype(jnp.float32),
      wf8,
      bf.reshape(1, 1).astype(jnp.float32))

    return out[0, :B].reshape(B, 1)


def init_params(key, n_in=115, hidden_layers=(64, 32)):
    """Deterministic synthetic init, PyTorch nn.Linear-style uniform bounds.
    Weights stored transposed: (in_features, out_features)."""
    params = {}
    dims = [n_in] + list(hidden_layers)
    keys = jax.random.split(key, 2 * (len(hidden_layers) + 1))
    ki = 0
    for i in range(len(hidden_layers)):
        fan_in, fan_out = dims[i], dims[i + 1]
        bound = 1.0 / jnp.sqrt(fan_in)
        params[f"w{i}"] = jax.random.uniform(keys[ki], (fan_in, fan_out),
                                             jnp.float32, -bound, bound)
        params[f"b{i}"] = jax.random.uniform(keys[ki + 1], (1, fan_out),
                                             jnp.float32, -bound, bound)
        ki += 2
    fan_in = dims[-1]
    bound = 1.0 / jnp.sqrt(fan_in)
    params["wf"] = jax.random.uniform(keys[ki], (fan_in, 1),
                                      jnp.float32, -bound, bound)
    params["bf"] = jax.random.uniform(keys[ki + 1], (1, 1),
                                      jnp.float32, -bound, bound)
    return params


def reference_forward(x, p):
    """Module semantics, full f32."""
    h = jnp.maximum(x @ p["w0"] + p["b0"], 0.0)
    h = jnp.maximum(h @ p["w1"] + p["b1"], 0.0)
    return jax.nn.sigmoid(h @ p["wf"] + p["bf"])


def reference_forward_matched(x, p):
    """Module math at the kernel's precision: bf16 matmul operands, f32 accumulation,
    f32 biases / ReLU / sigmoid."""
    bf16 = jnp.bfloat16
    h = jnp.dot(x.astype(bf16), p["w0"].astype(bf16),
                preferred_element_type=jnp.float32)
    h = jnp.maximum(h + p["b0"], 0.0)
    h = jnp.dot(h.astype(bf16), p["w1"].astype(bf16),
                preferred_element_type=jnp.float32) + p["b1"]
    h = jnp.maximum(h, 0.0)
    z = jnp.dot(h.astype(bf16), p["wf"].astype(bf16),
                preferred_element_type=jnp.float32) + p["bf"]
    return jax.nn.sigmoid(z)


if __name__ == "__main__":
    key = jax.random.PRNGKey(0)
    kx, kp = jax.random.split(key)

    # Small correctness demo: 300 rows with a 256-row tile -> padded to 512, two grid
    # tiles (exercises multi-tile grid + row padding).  Production uses block_b=8192.
    B, N_IN = 300, 115
    x = jax.random.normal(kx, (B, N_IN), jnp.float32)
    params = init_params(kp, n_in=N_IN, hidden_layers=(64, 32))

    out = binary_classifier_forward(x, params, block_b=256)
    out = jax.block_until_ready(out)

    assert out.shape == (B, 1)
    assert bool(jnp.all((out >= 0.0) & (out <= 1.0))), "probabilities outside [0, 1]"

    # Tight check vs a precision-matched reference (bf16 matmul operands everywhere).
    ref_m = reference_forward_matched(x, params)
    err_m = float(jnp.max(jnp.abs(out - ref_m)))
    assert err_m < 5e-3, f"matched-precision max abs err {err_m}"

    # Looser sanity check vs the pure-f32 module semantics (covers all bf16 rounding).
    ref_f = reference_forward(x, params)
    err_f = float(jnp.max(jnp.abs(out - ref_f)))
    assert err_f < 3e-2, f"f32-reference max abs err {err_f}"

    print("KERNEL_OK")
</pallas_src>

<mosaic_0001>
module attributes {stable_mosaic.version = 11 : i64} {
  func.func @mlp_kernel(%arg0: i32, %arg1: memref<256x115xf32, #tpu.memory_space<vmem>>, %arg2: memref<115x64xbf16, #tpu.memory_space<vmem>>, %arg3: memref<1x64xf32, #tpu.memory_space<vmem>>, %arg4: memref<64x32xbf16, #tpu.memory_space<vmem>>, %arg5: memref<1x32xf32, #tpu.memory_space<vmem>>, %arg6: memref<8x32xbf16, #tpu.memory_space<vmem>>, %arg7: memref<1x1xf32, #tpu.memory_space<vmem>>, %arg8: memref<1x256xf32, #tpu.memory_space<vmem>>) attributes {dimension_semantics = [#tpu.dimension_semantics<parallel>], iteration_bounds = array<i64: 2>, scalar_prefetch = 0 : i64, scratch_operands = 0 : i64, tpu.core_type = #tpu.core_type<tc>, window_params = [{transform_indices = @transform_0, window_bounds = array<i64: 256, 115>}, {pipeline_mode = #tpu.pipeline_mode<synchronous>, transform_indices = @transform_1, window_bounds = array<i64: 115, 64>}, {pipeline_mode = #tpu.pipeline_mode<synchronous>, transform_indices = @transform_2, window_bounds = array<i64: 1, 64>}, {pipeline_mode = #tpu.pipeline_mode<synchronous>, transform_indices = @transform_3, window_bounds = array<i64: 64, 32>}, {pipeline_mode = #tpu.pipeline_mode<synchronous>, transform_indices = @transform_4, window_bounds = array<i64: 1, 32>}, {pipeline_mode = #tpu.pipeline_mode<synchronous>, transform_indices = @transform_5, window_bounds = array<i64: 8, 32>}, {pipeline_mode = #tpu.pipeline_mode<synchronous>, transform_indices = @transform_6, window_bounds = array<i64: 1, 1>}, {transform_indices = @transform_7, window_bounds = array<i64: 1, 256>}]} {
    %c0 = arith.constant 0 : index
    %c0_0 = arith.constant 0 : index
    %0 = vector.load %arg1[%c0, %c0_0] : memref<256x115xf32, #tpu.memory_space<vmem>>, vector<256x115xf32>
    %1 = arith.truncf %0 : vector<256x115xf32> to vector<256x115xbf16>
    %c0_1 = arith.constant 0 : index
    %c0_2 = arith.constant 0 : index
    %2 = vector.load %arg2[%c0_1, %c0_2] : memref<115x64xbf16, #tpu.memory_space<vmem>>, vector<115x64xbf16>
    %cst = arith.constant dense<0.000000e+00> : vector<256x64xf32>
    %3 = tpu.matmul %1, %2, %cst {dimension_numbers = #tpu.dot_dimension_numbers<[1], [0], [0], [1], [0, 0, 1, 1], [], []>} : vector<256x115xbf16>, vector<115x64xbf16>, vector<256x64xf32> -> vector<256x64xf32>
    %c0_3 = arith.constant 0 : index
    %c0_4 = arith.constant 0 : index
    %4 = vector.load %arg3[%c0_3, %c0_4] : memref<1x64xf32, #tpu.memory_space<vmem>>, vector<1x64xf32>
    %5 = vector.broadcast %4 : vector<1x64xf32> to vector<256x64xf32>
    %6 = arith.addf %3, %5 : vector<256x64xf32>
    %cst_5 = arith.constant 0.000000e+00 : f32
    %7 = vector.broadcast %cst_5 : f32 to vector<256x64xf32>
    %8 = arith.maximumf %6, %7 : vector<256x64xf32>
    %9 = arith.truncf %8 : vector<256x64xf32> to vector<256x64xbf16>
    %c0_6 = arith.constant 0 : index
    %c0_7 = arith.constant 0 : index
    %10 = vector.load %arg4[%c0_6, %c0_7] : memref<64x32xbf16, #tpu.memory_space<vmem>>, vector<64x32xbf16>
    %cst_8 = arith.constant dense<0.000000e+00> : vector<256x32xf32>
    %11 = tpu.matmul %9, %10, %cst_8 {dimension_numbers = #tpu.dot_dimension_numbers<[1], [0], [0], [1], [0, 0, 1, 1], [], []>} : vector<256x64xbf16>, vector<64x32xbf16>, vector<256x32xf32> -> vector<256x32xf32>
    %c0_9 = arith.constant 0 : index
    %c0_10 = arith.constant 0 : index
    %12 = vector.load %arg5[%c0_9, %c0_10] : memref<1x32xf32, #tpu.memory_space<vmem>>, vector<1x32xf32>
    %13 = vector.broadcast %12 : vector<1x32xf32> to vector<256x32xf32>
    %14 = arith.addf %11, %13 : vector<256x32xf32>
    %cst_11 = arith.constant 0.000000e+00 : f32
    %15 = vector.broadcast %cst_11 : f32 to vector<256x32xf32>
    %16 = arith.maximumf %14, %15 : vector<256x32xf32>
    %17 = arith.truncf %16 : vector<256x32xf32> to vector<256x32xbf16>
    %c0_12 = arith.constant 0 : index
    %c0_13 = arith.constant 0 : index
    %18 = vector.load %arg6[%c0_12, %c0_13] : memref<8x32xbf16, #tpu.memory_space<vmem>>, vector<8x32xbf16>
    %cst_14 = arith.constant dense<0.000000e+00> : vector<8x256xf32>
    %19 = tpu.matmul %18, %17, %cst_14 {dimension_numbers = #tpu.dot_dimension_numbers<[1], [1], [0], [0], [0, 0, 1, 0], [], []>} : vector<8x32xbf16>, vector<256x32xbf16>, vector<8x256xf32> -> vector<8x256xf32>
    %20 = vector.extract_strided_slice %19 {offsets = [0, 0], sizes = [1, 256], strides = [1, 1]} : vector<8x256xf32> to vector<1x256xf32>
    %c0_15 = arith.constant 0 : index
    %c0_16 = arith.constant 0 : index
    %21 = vector.load %arg7[%c0_15, %c0_16] : memref<1x1xf32, #tpu.memory_space<vmem>>, vector<1x1xf32>
    %22 = vector.broadcast %21 : vector<1x1xf32> to vector<1x256xf32>
    %23 = arith.addf %20, %22 : vector<1x256xf32>
    %cst_17 = arith.constant 0.000000e+00 : f32
    %24 = vector.broadcast %cst_17 : f32 to vector<1x256xf32>
    %25 = arith.subf %24, %23 : vector<1x256xf32>
    %26 = math.exp %25 : vector<1x256xf32>
    %cst_18 = arith.constant 1.000000e+00 : f32
    %27 = vector.broadcast %cst_18 : f32 to vector<1x256xf32>
    %28 = arith.addf %27, %26 : vector<1x256xf32>
    %cst_19 = arith.constant 1.000000e+00 : f32
    %29 = vector.broadcast %cst_19 : f32 to vector<1x256xf32>
    %30 = arith.divf %29, %28 : vector<1x256xf32>
    %c0_20 = arith.constant 0 : index
    %c0_21 = arith.constant 0 : index
    %31 = vector.load %arg8[%c0_20, %c0_21] : memref<1x256xf32, #tpu.memory_space<vmem>>, vector<1x256xf32>
    tpu.vector_store %arg8[%c0_20, %c0_21], %30 {strides = array<i32>} : memref<1x256xf32, #tpu.memory_space<vmem>>, vector<1x256xf32>,
    return
  }
  func.func @transform_0(%arg0: i32) -> (i32, i32) {
    %c0_i32 = arith.constant 0 : i32
    %c0_i32_0 = arith.constant 0 : i32
    return %arg0, %c0_i32 : i32, i32
  }
  func.func @transform_1(%arg0: i32) -> (i32, i32) {
    %c0_i32 = arith.constant 0 : i32
    %c0_i32_0 = arith.constant 0 : i32
    %c0_i32_1 = arith.constant 0 : i32
    return %c0_i32, %c0_i32_0 : i32, i32
  }
  func.func @transform_2(%arg0: i32) -> (i32, i32) {
    %c0_i32 = arith.constant 0 : i32
    %c0_i32_0 = arith.constant 0 : i32
    %c0_i32_1 = arith.constant 0 : i32
    return %c0_i32, %c0_i32_0 : i32, i32
  }
  func.func @transform_3(%arg0: i32) -> (i32, i32) {
    %c0_i32 = arith.constant 0 : i32
    %c0_i32_0 = arith.constant 0 : i32
    %c0_i32_1 = arith.constant 0 : i32
    return %c0_i32, %c0_i32_0 : i32, i32
  }
  func.func @transform_4(%arg0: i32) -> (i32, i32) {
    %c0_i32 = arith.constant 0 : i32
    %c0_i32_0 = arith.constant 0 : i32
    %c0_i32_1 = arith.constant 0 : i32
    return %c0_i32, %c0_i32_0 : i32, i32
  }
  func.func @transform_5(%arg0: i32) -> (i32, i32) {
    %c0_i32 = arith.constant 0 : i32
    %c0_i32_0 = arith.constant 0 : i32
    %c0_i32_1 = arith.constant 0 : i32
    return %c0_i32, %c0_i32_0 : i32, i32
  }
  func.func @transform_6(%arg0: i32) -> (i32, i32) {
    %c0_i32 = arith.constant 0 : i32
    %c0_i32_0 = arith.constant 0 : i32
    %c0_i32_1 = arith.constant 0 : i32
    return %c0_i32, %c0_i32_0 : i32, i32
  }
  func.func @transform_7(%arg0: i32) -> (i32, i32) {
    %c0_i32 = arith.constant 0 : i32
    %c0_i32_0 = arith.constant 0 : i32
    return %c0_i32, %arg0 : i32, i32
  }
}

</mosaic_0001>

<bundles_post_ra>
// kernel: tpu_custom_call.1
= control target key start
LH: loop header
LB: loop body
LE: loop exit
PB: predicated region body
PF: predicated region fallthrough
CT: control target
= control target key end

     0   :  { %s1891_s0 = inlined_call_operand.vmem [shape: f32[512,115], index: 0, kind: input, shape index: {}]   ;;  %s1892_s1 = inlined_call_operand.vmem [shape: bf16[115,64], index: 1, kind: input, shape index: {}]   ;;  %s1893_s2 = inlined_call_operand.vmem [shape: f32[1,64], index: 2, kind: input, shape index: {}]   ;;  %s1894_s3 = inlined_call_operand.vmem [shape: bf16[64,32], index: 3, kind: input, shape index: {}]   ;;  %s1895_s4 = inlined_call_operand.vmem [shape: f32[1,32], index: 4, kind: input, shape index: {}]   ;;  %s1896_s5 = inlined_call_operand.vmem [shape: bf16[8,32], index: 5, kind: input, shape index: {}]   ;;  %s1897_s6 = inlined_call_operand.<no memory space> [shape: f32[1,1], index: 6, kind: input, shape index: {}]   ;;  %s1898_s7 = inlined_call_operand.hbm [shape: f32[1,512], index: 7, kind: output, shape index: {}]  }
   0x1   :  { %v12_v0 = vstv %s1897_s6 }
   0x2   :  { %13 = vst [vmem:[#allocation2] sm:$0x1] %v12_v0 }
   0x3   :  { %14 = vsyncpa [#allocation4], 0 }
   0x4   :  { %16 = vsyncpa [#allocation4 + $0x1], 0  ;;  %s1567_s26 = smov 0   ;;  %s1569_s27 = smov 0  }
   0x5   :  { %s1571_s28 = smov 0   ;;  %s1573_s29 = smov 0  }
   0x6 LB: > { %s1174_s6 = sadd.s32 4294967295, %s1518_s29   ;;  %s1175_s30 = sadd.s32 4294967294, %s1518_s29   ;;  %s1518_s29 = sphi %s1573_s29, %s1904_s29   ;;  %s1514_s28 = sphi %s1571_s28, %s1903_s28   ;;  %s1510_s27 = sphi %s1569_s27, %s1902_s27   ;;  %s1506_s26 = sphi %s1567_s26, %s1901_s26  }
   0x7   : > { %s1590_s8 = sadd.s32 1, %s1518_s29   ;;  %s181_s9 = sadd.s32 1, %s1514_s28 }
   0x8   : > { %s178_s10 = ssub.s32 %s1518_s29, %s1590_s8  ;;  %p191_p0 = scmp.ne.s32.totalorder %s1514_s28, %s1510_s27 }
   0x9   : > { %p179_p1 = scmp.eq.s32.totalorder %s178_s10, 0  ;;  %p192_p2 = scmp.eq.s32.totalorder %s1174_s6, 1 }
   0xa   : > { %p197_p3 = scmp.ne.s32.totalorder %s1510_s27, %s1506_s26  ;;  %p198_p4 = scmp.eq.s32.totalorder %s1175_s30, 1 }
   0xb   : > { %s1600_s11 = scalar_select %p179_p1, %s1514_s28, %s181_s9  }
   0xc   : > { %p1602_p5 = por %p192_p2, %p191_p0  ;;  %p1606_p6 = por %p198_p4, %p197_p3 }
   0xd   : > { %p1178_p7 = scmp.ge.s32.totalorder %s1518_s29, 1  ;;  %p243_p8 = scmp.lt.s32.totalorder %s1518_s29, 3 }
   0xf   : > { %p244_p9 = pnand %p1178_p7, %p243_p8 }
  0x10   : > { %v1436_v1 = vld [vmem:[%s1892_s1] sm:$0xff] (!%p244_p9)   ;;  %v1437_v2 = vld [vmem:[%s1892_s1 + $0x8] sm:$0xff] (!%p244_p9)   ;;  %v1438_v3 = vld [vmem:[%s1892_s1 + $0x10] sm:$0xff] (!%p244_p9)   ;;  %s1621_s20 = sshll.u32 (!%p244_p9), %s1174_s6, 5  ;;  %vm398_vm0 = vcmask (!%p244_p9), 941056   ;;  %vm447_vm1 = vcmask (!%p244_p9), 1040384  }
  0x11   : > { %247 = sbr.rel (%p244_p9) target bundleno = 851 (0x353), region = 48  ;;  %1297 = vmatprep.subr.bf16.mxu0 (!%p244_p9), %v1436_v1  ;;  %p276_p10 = scmp.lt.s32.totalorder (!%p244_p9), %s1621_s20, 63  ;;  %v1439_v4 = vld [vmem:[%s1892_s1 + $0x18] sm:$0xff] (!%p244_p9)   ;;  %v1444_v5 = vld [vmem:[%s1894_s3] sm:$0xff] (!%p244_p9)   ;;  %v1445_v6 = vld [vmem:[%s1894_s3 + $0x8] sm:$0xff] (!%p244_p9)   ;;  %vm448_vm2 = vcmask (!%p244_p9), 1041408  }
  0x12   : > { %1298 = vmatpush3.bf16.msra.mxu0 (!%p244_p9), %v1436_v1  ;;  %1345 = vmatprep.subr.bf16.mxu1 (!%p244_p9), %v1444_v5  ;;  %v1440_v7 = vld [vmem:[%s1892_s1 + $0x20] sm:$0xff] (!%p244_p9)   ;;  %v1441_v11 = vld [vmem:[%s1892_s1 + $0x28] sm:$0xff] (!%p244_p9)   ;;  %v1520_v12 = vmov (!%p244_p9), 65535   ;;  %v1442_v14 = vld [vmem:[%s1892_s1 + $0x30] sm:$0xff] (!%p244_p9)   ;;  %vm702_vm3 = vcmask (!%p244_p9), 523264   ;;  %vm961_vm4 = vcmask (!%p244_p9), 261120   ;;  %s1849_s30 = scalar_lea.hbm (!%p244_p9), %s1898_s7, %s1621_s20 }
  0x13   : > { %1299 = vmatprep.subr.bf16.mxu0 (!%p244_p9), %v1437_v2  ;;  %1346 = vmatpush3.bf16.msra.mxu1 (!%p244_p9), %v1444_v5  ;;  %v449_v13 = vsel (!%p244_p9), %vm447_vm1, 4294967295, %v1520_v12  ;;  %v1443_v15 = vld [vmem:[%s1892_s1 + $0x38] ss:$0 sps:$4 sm:$0x33] (!%p244_p9)   ;;  %v1446_v63 = vld [vmem:[%s1894_s3 + $0x10] sm:$0xff] (!%p244_p9)   ;;  %s272_s19 = sand.u32 (!%p244_p9), 1, %s1510_s27  }
  0x14   : > { %1347 = vmatprep.subr.bf16.mxu1 (!%p244_p9), %v1445_v6  ;;  %v450_v16 = vsel (!%p244_p9), %vm448_vm2, %v449_v13, 0  ;;  %v1447_v0 = vld [vmem:[%s1894_s3 + $0x18] sm:$0xff] (!%p244_p9)   ;;  %v1708_v1 = vld [vmem:[%s1893_s2] ss:$0 sm:$0xff] (!%p244_p9)  ;;  %s1179_s21 = sshll.u32 (!%p244_p9), %s272_s19, 1  ;;  %s1102_s9 = scalar_lea.sflag (!%p244_p9), [#allocation4], %s272_s19 }
  0x15   : > { %v452_v17 = vand.u32 (!%p244_p9), %v1443_v15, %v450_v16  ;;  %s274_s22 = scalar_lea.vmem (!%p244_p9), [#allocation3], %s1179_s21  ;;  %s1523_s10 = smov (!%p244_p9), [#allocation3]  }
  0x16   : > { %1300 = vmatpush3.bf16.msra.mxu0 (!%p244_p9), %v1437_v2  ;;  %s1460_s14 = sshll.u32 (!%p244_p9), %s1523_s10, 4  ;;  %s1461_s14 = int_to_ptr.vmem [resolvable:$false] %s1460_s14 }
  0x17   : > { %1301 = vmatprep.subr.bf16.mxu0 (!%p244_p9), %v1438_v3  ;;  %1348 = vmatpush3.bf16.msra.mxu1 (!%p244_p9), %v1445_v6 }
  0x18   : > { %s277_s23 = scalar_select %p276_p10, %s1621_s20, 63  ;;  %1349 = vmatprep.subr.bf16.mxu1 %v1446_v63 }
  0x1a   : > { %s1181_s6 = sshll.u32 %s277_s23, 3  ;;  %1302 = vmatpush3.bf16.msra.mxu0 %v1438_v3  ;;  %s1116_s23 = sshll.u32 %s274_s22, 4  ;;  %s1851_s23 = int_to_ptr.vmem [resolvable:$true] %s1116_s23 }
  0x1b   : > { %s1637_s15 = scalar_lea.vmem %s1891_s0, %s1181_s6  ;;  %1303 = vmatprep.subr.bf16.mxu0 %v1439_v4  ;;  %1350 = vmatpush3.bf16.msra.mxu1 %v1446_v63  ;;  %s1456_s6 = scalar_lea.vmem %s1851_s23, 32 }
  0x1c   : > { %v283_v8 = vld [vmem:[%s1637_s15] sm:$0xff]  ;;  %v284_v9 = vld [vmem:[%s1637_s15 + $0x8] sm:$0xff]  ;;  %v285_v18 = vld [vmem:[%s1637_s15 + $0x10] sm:$0xff]  ;;  %1351 = vmatprep.subr.bf16.mxu1 %v1447_v0  ;;  %p1457_p11 = scmp.ne.s32.totalorder %s1851_s23, %s1456_s6  ;;  %p1463_p0 = scmp.lt.s32.totalorder %s1851_s23, %s1461_s14 }
  0x1d   : > { %v315_v10 = vpack.c.bf16 %v284_v9, %v283_v8  ;;  %v286_v19 = vld [vmem:[%s1637_s15 + $0x18] sm:$0xff]  ;;  %v287_v20 = vld [vmem:[%s1637_s15 + $0x20] sm:$0xff]  ;;  %v288_v21 = vld [vmem:[%s1637_s15 + $0x28] sm:$0xff] }
  0x1e   : > { %1304 = vmatpush3.bf16.msra.mxu0 %v1439_v4  ;;  %v316_v22 = vpack.c.bf16 %v286_v19, %v285_v18  ;;  %v317_v23 = vpack.c.bf16 %v288_v21, %v287_v20  ;;  %v289_v24 = vld [vmem:[%s1637_s15 + $0x30] sm:$0xff]  ;;  %v290_v25 = vld [vmem:[%s1637_s15 + $0x38] sm:$0xff]  ;;  %v291_v26 = vld [vmem:[%s1637_s15 + $0x40] sm:$0xff]  ;;  %p1458_p12 = pnand %p1457_p11, %p1602_p5 }
  0x1f   : > { %1313 = vmatprep.mubr.msk.bf16.mxu0 %vm398_vm0, %v315_v10  ;;  %1305 = vmatprep.subr.bf16.mxu0 %v1440_v7  ;;  %v292_v27 = vld [vmem:[%s1637_s15 + $0x48] sm:$0xff]  ;;  %v318_v28 = vpack.c.bf16 %v290_v25, %v289_v24  ;;  %v293_v30 = vld [vmem:[%s1637_s15 + $0x50] sm:$0xff]  ;;  %v294_v31 = vld [vmem:[%s1637_s15 + $0x58] sm:$0xff] }
  0x20   : > { %v319_v29 = vpack.c.bf16 %v292_v27, %v291_v26  ;;  %v295_v32 = vld [vmem:[%s1637_s15 + $0x60] sm:$0xff]  ;;  %v296_v33 = vld [vmem:[%s1637_s15 + $0x68] sm:$0xff]  ;;  %v320_v34 = vpack.c.bf16 %v294_v31, %v293_v30  ;;  %v297_v36 = vld [vmem:[%s1637_s15 + $0x70] sm:$0xff]  ;;  %1352 = vmatpush3.bf16.msra.mxu1 %v1447_v0  ;;  %p1459_p13 = pneg %p1458_p12 }
  0x21   : > { %v321_v35 = vpack.c.bf16 %v296_v33, %v295_v32  ;;  %v298_v37 = vld [vmem:[%s1637_s15 + $0x78] sm:$0xff]  ;;  %v299_v38 = vld [vmem:[%s1637_s15 + $0x80] sm:$0xff]  ;;  %v300_v39 = vld [vmem:[%s1637_s15 + $0x88] sm:$0xff] }
  0x22   : > { %1306 = vmatpush3.bf16.msra.mxu0 %v1440_v7  ;;  %v322_v40 = vpack.c.bf16 %v298_v37, %v297_v36  ;;  %v323_v41 = vpack.c.bf16 %v300_v39, %v299_v38  ;;  %v301_v42 = vld [vmem:[%s1637_s15 + $0x90] sm:$0xff]  ;;  %v302_v43 = vld [vmem:[%s1637_s15 + $0x98] sm:$0xff]  ;;  %v303_v44 = vld [vmem:[%s1637_s15 + $0xa0] sm:$0xff] }
  0x23   : > { %1307 = vmatprep.subr.bf16.mxu0 %v1441_v11  ;;  %v304_v45 = vld [vmem:[%s1637_s15 + $0xa8] sm:$0xff]  ;;  %v324_v46 = vpack.c.bf16 %v302_v43, %v301_v42  ;;  %v305_v48 = vld [vmem:[%s1637_s15 + $0xb0] sm:$0xff]  ;;  %v306_v49 = vld [vmem:[%s1637_s15 + $0xb8] sm:$0xff] }
  0x24   : > { %v325_v47 = vpack.c.bf16 %v304_v45, %v303_v44  ;;  %v307_v50 = vld [vmem:[%s1637_s15 + $0xc0] sm:$0xff]  ;;  %v308_v51 = vld [vmem:[%s1637_s15 + $0xc8] sm:$0xff]  ;;  %v326_v52 = vpack.c.bf16 %v306_v49, %v305_v48  ;;  %v309_v54 = vld [vmem:[%s1637_s15 + $0xd0] sm:$0xff] }
  0x25   : > { %v327_v53 = vpack.c.bf16 %v308_v51, %v307_v50  ;;  %v310_v55 = vld [vmem:[%s1637_s15 + $0xd8] sm:$0xff]  ;;  %v311_v56 = vld [vmem:[%s1637_s15 + $0xe0] sm:$0xff]  ;;  %v312_v57 = vld [vmem:[%s1637_s15 + $0xe8] sm:$0xff] }
  0x26   : > { %1308 = vmatpush3.bf16.msra.mxu0 %v1441_v11  ;;  %v328_v58 = vpack.c.bf16 %v310_v55, %v309_v54  ;;  %v329_v59 = vpack.c.bf16 %v312_v57, %v311_v56  ;;  %v313_v60 = vld [vmem:[%s1637_s15 + $0xf0] sm:$0xff]  ;;  %v314_v61 = vld [vmem:[%s1637_s15 + $0xf8] sm:$0xff]  ;;  %s1462_s15 = scalar_lea.vmem %s1461_s14, 64 }
  0x27   : > { %1309 = vmatprep.subr.bf16.mxu0 %v1442_v14  ;;  %v330_v62 = vpack.c.bf16 %v314_v61, %v313_v60  ;;  %p1464_p1 = scmp.lt.s32.totalorder %s1462_s15, %s1456_s6 }
  0x29   : > { %p1465_p2 = por %p1464_p1, %p1463_p0 }
  0x2a   : > { %1310 = vmatpush3.bf16.msra.mxu0 %v1442_v14 }
  0x2b   : > { %1311 = vmatprep.subr.bf16.mxu0 %v452_v17  ;;  %p1466_p3 = pnand %p1465_p2, %p1459_p13 }
  0x2e   : > { %1312 = vmatpush3.bf16.msra.mxu0 %v452_v17 }
  0x31   : > { %1314 = vmatmul.mubr.msk.bf16.vlgmr.msra.gmra.mrb[0].mxu0 %vm398_vm0, %v316_v22 }
  0x32   : > { %1317 = vmatprep.mubr.msk.bf16.mxu0 %vm398_vm0, %v317_v23 }
  0x39   : > { %1318 = vmatmul.mubr.msk.bf16.gmra.mrb[4].mxu0 %vm398_vm0, %v318_v28 }
  0x3a   : > { %1321 = vmatprep.mubr.msk.bf16.mxu0 %vm398_vm0, %v319_v29 }
  0x41   : > { %1322 = vmatmul.mubr.msk.bf16.gmra.mrb[8].mxu0 %vm398_vm0, %v320_v34 }
  0x42   : > { %1325 = vmatprep.mubr.msk.bf16.mxu0 %vm398_vm0, %v321_v35 }
  0x49   : > { %1326 = vmatmul.mubr.msk.bf16.gmra.mrb[12].mxu0 %vm398_vm0, %v322_v40 }
  0x4a   : > { %1329 = vmatprep.mubr.msk.bf16.mxu0 %vm398_vm0, %v323_v41 }
  0x51   : > { %1330 = vmatmul.mubr.msk.bf16.gmra.mrb[16].mxu0 %vm398_vm0, %v324_v46 }
  0x52   : > { %1333 = vmatprep.mubr.msk.bf16.mxu0 %vm398_vm0, %v325_v47 }
  0x59   : > { %1334 = vmatmul.mubr.msk.bf16.gmra.mrb[20].mxu0 %vm398_vm0, %v326_v52 }
  0x5a   : > { %1337 = vmatprep.mubr.msk.bf16.mxu0 %vm398_vm0, %v327_v53 }
  0x61   : > { %1338 = vmatmul.mubr.msk.bf16.gmra.mrb[24].mxu0 %vm398_vm0, %v328_v58 }
  0x62   : > { %1341 = vmatprep.mubr.msk.bf16.mxu0 %vm398_vm0, %v329_v59 }
  0x69   : > { %1342 = vmatmul.mubr.msk.bf16.gmra.mrb[28].mxu0 %vm398_vm0, %v330_v62 }
 0x104   : > { %v1315_v2 = vpop.f32.mrb[0].mxu0 }
 0x105   : > { %v497_v3 = vadd.f32 %v1315_v2, %v1708_v1  ;;  %v488_v4 = vpop.f32.mrb[1].mxu0 }
 0x106   : > { %v489_v5 = vadd.f32 %v1708_v1, %v488_v4  ;;  %v1316_v6 = vpop.f32.mrb[2].mxu0 }
 0x107   : > { %v500_v7 = vadd.f32 %v1316_v6, %v1708_v1  ;;  %v491_v8 = vpop.f32.mrb[3].mxu0  ;;  %v617_v10 = vmax.f32 %v497_v3, 0.0 }
 0x108   : > { %v492_v9 = vadd.f32 %v1708_v1, %v491_v8  ;;  %v615_v12 = vmax.f32 %v489_v5, 0.0 }
 0x109   : > { %v618_v11 = vmax.f32 %v500_v7, 0.0 }
 0x10a   : > { %v616_v13 = vmax.f32 %v492_v9, 0.0 }
 0x10b   : > { %v648_v14 = vpack.c.bf16 %v618_v11, %v617_v10 }
 0x10c   : > { %v1319_v15 = vpop.f32.mrb[4].mxu0  ;;  %v647_v16 = vpack.c.bf16 %v616_v13, %v615_v12 }
 0x10d   : > { %v513_v17 = vadd.f32 %v1319_v15, %v1708_v1  ;;  %v504_v18 = vpop.f32.mrb[5].mxu0 }
 0x10e   : > { %v505_v19 = vadd.f32 %v1708_v1, %v504_v18  ;;  %v1320_v20 = vpop.f32.mrb[6].mxu0  ;;  %1353 = vmatprep.mubr.msk.bf16.mxu1 %vm702_vm3, %v647_v16 }
 0x10f   : > { %v516_v21 = vadd.f32 %v1320_v20, %v1708_v1  ;;  %v507_v22 = vpop.f32.mrb[7].mxu0  ;;  %1354 = vmatmul.mubr.msk.bf16.vlgmr.msra.gmra.mrb[0].mxu1 %vm702_vm3, %v648_v14  ;;  %v621_v24 = vmax.f32 %v513_v17, 0.0 }
 0x110   : > { %v508_v23 = vadd.f32 %v1708_v1, %v507_v22  ;;  %v619_v26 = vmax.f32 %v505_v19, 0.0 }
 0x111   : > { %v622_v25 = vmax.f32 %v516_v21, 0.0 }
 0x112   : > { %v620_v27 = vmax.f32 %v508_v23, 0.0 }
 0x113   : > { %v650_v28 = vpack.c.bf16 %v622_v25, %v621_v24 }
 0x114   : > { %v649_v29 = vpack.c.bf16 %v620_v27, %v619_v26  ;;  %v1323_v30 = vpop.f32.mrb[8].mxu0 }
 0x115   : > { %v529_v31 = vadd.f32 %v1323_v30, %v1708_v1  ;;  %v520_v32 = vpop.f32.mrb[9].mxu0 }
 0x116   : > { %v521_v33 = vadd.f32 %v1708_v1, %v520_v32  ;;  %v1324_v34 = vpop.f32.mrb[10].mxu0  ;;  %1357 = vmatprep.mubr.msk.bf16.mxu1 %vm702_vm3, %v649_v29 }
 0x117   : > { %v532_v35 = vadd.f32 %v1324_v34, %v1708_v1  ;;  %v523_v36 = vpop.f32.mrb[11].mxu0  ;;  %1358 = vmatmul.mubr.msk.bf16.gmra.mrb[4].mxu1 %vm702_vm3, %v650_v28  ;;  %v625_v38 = vmax.f32 %v529_v31, 0.0 }
 0x118   : > { %v524_v37 = vadd.f32 %v1708_v1, %v523_v36  ;;  %v623_v40 = vmax.f32 %v521_v33, 0.0 }
 0x119   : > { %v626_v39 = vmax.f32 %v532_v35, 0.0 }
 0x11a   : > { %v624_v41 = vmax.f32 %v524_v37, 0.0 }
 0x11b   : > { %v652_v42 = vpack.c.bf16 %v626_v39, %v625_v38 }
 0x11c   : > { %v651_v43 = vpack.c.bf16 %v624_v41, %v623_v40  ;;  %v1327_v44 = vpop.f32.mrb[12].mxu0 }
 0x11d   : > { %v545_v45 = vadd.f32 %v1327_v44, %v1708_v1  ;;  %v536_v46 = vpop.f32.mrb[13].mxu0 }
 0x11e   : > { %v537_v47 = vadd.f32 %v1708_v1, %v536_v46  ;;  %v1328_v48 = vpop.f32.mrb[14].mxu0  ;;  %1361 = vmatprep.mubr.msk.bf16.mxu1 %vm702_vm3, %v651_v43 }
 0x11f   : > { %v548_v49 = vadd.f32 %v1328_v48, %v1708_v1  ;;  %v539_v50 = vpop.f32.mrb[15].mxu0  ;;  %1362 = vmatmul.mubr.msk.bf16.gmra.mrb[8].mxu1 %vm702_vm3, %v652_v42  ;;  %v629_v52 = vmax.f32 %v545_v45, 0.0 }
 0x120   : > { %v540_v51 = vadd.f32 %v1708_v1, %v539_v50  ;;  %v627_v54 = vmax.f32 %v537_v47, 0.0 }
 0x121   : > { %v630_v53 = vmax.f32 %v548_v49, 0.0 }
 0x122   : > { %v628_v55 = vmax.f32 %v540_v51, 0.0  ;;  %v1761_v51 = vld [vmem:[%s1896_s5] sm:$0xf] }
 0x123   : > { %v654_v56 = vpack.c.bf16 %v630_v53, %v629_v52  ;;  %v1054_v52 = vld [vmem:[#allocation2] sm:$0x1]  ;;  %v1521_v53 = vmov 0  }
 0x124   : > { %v653_v57 = vpack.c.bf16 %v628_v55, %v627_v54  ;;  %v1331_v58 = vpop.f32.mrb[16].mxu0  ;;  %1435 = vset.pattern.permute.xlu0 %v1521_v53 }
 0x125   : > { %v561_v59 = vadd.f32 %v1331_v58, %v1708_v1  ;;  %v552_v60 = vpop.f32.mrb[17].mxu0  ;;  %1057 = vperm.xlu0 %1435, %v1054_v52  }
 0x126   : > { %v553_v61 = vadd.f32 %v1708_v1, %v552_v60  ;;  %v1332_v62 = vpop.f32.mrb[18].mxu0  ;;  %1365 = vmatprep.mubr.msk.bf16.mxu1 %vm702_vm3, %v653_v57 }
 0x127   : > { %v564_v63 = vadd.f32 %v1332_v62, %v1708_v1  ;;  %v555_v0 = vpop.f32.mrb[19].mxu0  ;;  %1366 = vmatmul.mubr.msk.bf16.gmra.mrb[12].mxu1 %vm702_vm3, %v654_v56  ;;  %v633_v3 = vmax.f32 %v561_v59, 0.0 }
 0x128   : > { %v556_v2 = vadd.f32 %v1708_v1, %v555_v0  ;;  %v631_v5 = vmax.f32 %v553_v61, 0.0 }
 0x129   : > { %v634_v4 = vmax.f32 %v564_v63, 0.0 }
 0x12a   : > { %v632_v6 = vmax.f32 %v556_v2, 0.0 }
 0x12b   : > { %v656_v7 = vpack.c.bf16 %v634_v4, %v633_v3 }
 0x12c   : > { %v655_v8 = vpack.c.bf16 %v632_v6, %v631_v5  ;;  %v1335_v9 = vpop.f32.mrb[20].mxu0 }
 0x12d   : > { %v577_v10 = vadd.f32 %v1335_v9, %v1708_v1  ;;  %v568_v11 = vpop.f32.mrb[21].mxu0 }
 0x12e   : > { %v569_v12 = vadd.f32 %v1708_v1, %v568_v11  ;;  %1369 = vmatprep.mubr.msk.bf16.mxu1 %vm702_vm3, %v655_v8  ;;  %v1336_v13 = vpop.f32.mrb[22].mxu0 }
 0x12f   : > { %v637_v14 = vmax.f32 %v577_v10, 0.0  ;;  %v580_v15 = vadd.f32 %v1336_v13, %v1708_v1  ;;  %1370 = vmatmul.mubr.msk.bf16.gmra.mrb[16].mxu1 %vm702_vm3, %v656_v7  ;;  %v571_v16 = vpop.f32.mrb[23].mxu0 }
 0x130   : > { %v635_v17 = vmax.f32 %v569_v12, 0.0  ;;  %v572_v18 = vadd.f32 %v1708_v1, %v571_v16 }
 0x131   : > { %v638_v19 = vmax.f32 %v580_v15, 0.0 }
 0x132   : > { %v636_v20 = vmax.f32 %v572_v18, 0.0 }
 0x133   : > { %v658_v21 = vpack.c.bf16 %v638_v19, %v637_v14 }
 0x134   : > { %v657_v22 = vpack.c.bf16 %v636_v20, %v635_v17  ;;  %v1339_v23 = vpop.f32.mrb[24].mxu0 }
 0x135   : > { %v593_v24 = vadd.f32 %v1339_v23, %v1708_v1  ;;  %v584_v25 = vpop.f32.mrb[25].mxu0 }
 0x136   : > { %1373 = vmatprep.mubr.msk.bf16.mxu1 %vm702_vm3, %v657_v22  ;;  %v585_v26 = vadd.f32 %v1708_v1, %v584_v25  ;;  %v1340_v27 = vpop.f32.mrb[26].mxu0 }
 0x137   : > { %1374 = vmatmul.mubr.msk.bf16.gmra.mrb[20].mxu1 %vm702_vm3, %v658_v21  ;;  %v641_v28 = vmax.f32 %v593_v24, 0.0  ;;  %v596_v29 = vadd.f32 %v1340_v27, %v1708_v1  ;;  %v587_v30 = vpop.f32.mrb[27].mxu0 }
 0x138   : > { %v639_v31 = vmax.f32 %v585_v26, 0.0  ;;  %v588_v32 = vadd.f32 %v1708_v1, %v587_v30 }
 0x139   : > { %v642_v33 = vmax.f32 %v596_v29, 0.0 }
 0x13a   : > { %v640_v34 = vmax.f32 %v588_v32, 0.0 }
 0x13b   : > { %v660_v35 = vpack.c.bf16 %v642_v33, %v641_v28 }
 0x13c   : > { %v659_v36 = vpack.c.bf16 %v640_v34, %v639_v31  ;;  %v1343_v37 = vpop.f32.mrb[28].mxu0 }
 0x13d   : > { %v609_v38 = vadd.f32 %v1343_v37, %v1708_v1  ;;  %v600_v39 = vpop.f32.mrb[29].mxu0 }
 0x13e   : > { %1377 = vmatprep.mubr.msk.bf16.mxu1 %vm702_vm3, %v659_v36  ;;  %v601_v40 = vadd.f32 %v1708_v1, %v600_v39  ;;  %v1344_v41 = vpop.f32.mrb[30].mxu0 }
 0x13f   : > { %1378 = vmatmul.mubr.msk.bf16.gmra.mrb[24].mxu1 %vm702_vm3, %v660_v35  ;;  %v645_v42 = vmax.f32 %v609_v38, 0.0  ;;  %v612_v43 = vadd.f32 %v1344_v41, %v1708_v1  ;;  %v603_v44 = vpop.f32.mrb[31].mxu0 }
 0x140   : > { %v643_v45 = vmax.f32 %v601_v40, 0.0  ;;  %v604_v46 = vadd.f32 %v1708_v1, %v603_v44  ;;  %v1768_v1 = vld [vmem:[%s1895_s4] ss:$0 sm:$0xff] }
 0x141   : > { %v646_v47 = vmax.f32 %v612_v43, 0.0 }
 0x142   : > { %v644_v48 = vmax.f32 %v604_v46, 0.0 }
 0x143   : > { %v662_v49 = vpack.c.bf16 %v646_v47, %v645_v42 }
 0x144   : > { %v661_v50 = vpack.c.bf16 %v644_v48, %v643_v45 }
 0x146   : > { %1381 = vmatprep.mubr.msk.bf16.mxu1 %vm702_vm3, %v661_v50 }
 0x147   : > { %1382 = vmatmul.mubr.msk.bf16.gmra.mrb[28].mxu1 %vm702_vm3, %v662_v49 }
 0x148   : > { %1295 = vmatprep.mubr.msk.bf16.mxu1 %vm961_vm4, %v1761_v51 }
 0x1e2   : > { %v1355_v54 = vpop.f32.mrb[0].mxu1 }
 0x1e3   : > { %v794_v55 = vadd.f32 %v1355_v54, %v1768_v1  ;;  %v785_v56 = vpop.f32.mrb[1].mxu1 }
 0x1e4   : > { %v786_v57 = vadd.f32 %v1768_v1, %v785_v56  ;;  %v1356_v58 = vpop.f32.mrb[2].mxu1 }
 0x1e5   : > { %v797_v59 = vadd.f32 %v1356_v58, %v1768_v1  ;;  %v788_v60 = vpop.f32.mrb[3].mxu1  ;;  %v914_v62 = vmax.f32 %v794_v55, 0.0 }
 0x1e6   : > { %v789_v61 = vadd.f32 %v1768_v1, %v788_v60  ;;  %v912_v0 = vmax.f32 %v786_v57, 0.0 }
 0x1e7   : > { %v915_v63 = vmax.f32 %v797_v59, 0.0 }
 0x1e8   : > { %v913_v2 = vmax.f32 %v789_v61, 0.0 }
 0x1e9   : > { %v1774_v3 = vpack.c.bf16 %v915_v63, %v914_v62 }
 0x1ea   : > { %v1776_v4 = vpack.c.bf16 %v913_v2, %v912_v0  ;;  %v1359_v5 = vpop.f32.mrb[4].mxu1 }
 0x1eb   : > { %v810_v6 = vadd.f32 %v1359_v5, %v1768_v1  ;;  %v801_v7 = vpop.f32.mrb[5].mxu1 }
 0x1ec   : > { %v802_v8 = vadd.f32 %v1768_v1, %v801_v7  ;;  %v1360_v9 = vpop.f32.mrb[6].mxu1 }
 0x1ed   : > { %v813_v10 = vadd.f32 %v1360_v9, %v1768_v1  ;;  %v804_v11 = vpop.f32.mrb[7].mxu1  ;;  %v918_v13 = vmax.f32 %v810_v6, 0.0  ;;  %v966_v6 = vsel %vm961_vm4, %v1776_v4, 0  ;;  %v969_v4 = vsel %vm961_vm4, %v1774_v3, 0 }
 0x1ee   : > { %v805_v12 = vadd.f32 %v1768_v1, %v804_v11  ;;  %v916_v15 = vmax.f32 %v802_v8, 0.0 }
 0x1ef   : > { %v919_v14 = vmax.f32 %v813_v10, 0.0 }
 0x1f0   : > { %v917_v16 = vmax.f32 %v805_v12, 0.0 }
 0x1f1   : > { %v1782_v17 = vpack.c.bf16 %v919_v14, %v918_v13 }
 0x1f2   : > { %v1784_v18 = vpack.c.bf16 %v917_v16, %v916_v15  ;;  %v1363_v19 = vpop.f32.mrb[8].mxu1 }
 0x1f3   : > { %v826_v20 = vadd.f32 %v1363_v19, %v1768_v1  ;;  %v817_v21 = vpop.f32.mrb[9].mxu1 }
 0x1f4   : > { %v818_v22 = vadd.f32 %v1768_v1, %v817_v21  ;;  %v1364_v23 = vpop.f32.mrb[10].mxu1 }
 0x1f5   : > { %v829_v24 = vadd.f32 %v1364_v23, %v1768_v1  ;;  %v820_v25 = vpop.f32.mrb[11].mxu1  ;;  %v922_v27 = vmax.f32 %v826_v20, 0.0 }
 0x1f6   : > { %v821_v26 = vadd.f32 %v1768_v1, %v820_v25  ;;  %v920_v29 = vmax.f32 %v818_v22, 0.0 }
 0x1f7   : > { %v923_v28 = vmax.f32 %v829_v24, 0.0 }
 0x1f8   : > { %v921_v30 = vmax.f32 %v821_v26, 0.0 }
 0x1f9   : > { %v1790_v31 = vpack.c.bf16 %v923_v28, %v922_v27 }
 0x1fa   : > { %v1792_v32 = vpack.c.bf16 %v921_v30, %v920_v29  ;;  %v1367_v33 = vpop.f32.mrb[12].mxu1 }
 0x1fb   : > { %v842_v34 = vadd.f32 %v1367_v33, %v1768_v1  ;;  %v833_v35 = vpop.f32.mrb[13].mxu1 }
 0x1fc   : > { %v834_v36 = vadd.f32 %v1768_v1, %v833_v35  ;;  %v1368_v37 = vpop.f32.mrb[14].mxu1 }
 0x1fd   : > { %v845_v38 = vadd.f32 %v1368_v37, %v1768_v1  ;;  %v836_v39 = vpop.f32.mrb[15].mxu1  ;;  %v926_v41 = vmax.f32 %v842_v34, 0.0 }
 0x1fe   : > { %v837_v40 = vadd.f32 %v1768_v1, %v836_v39  ;;  %v924_v43 = vmax.f32 %v834_v36, 0.0  ;;  %v972_v36 = vsel %vm961_vm4, %v1784_v18, 0  ;;  %v975_v18 = vsel %vm961_vm4, %v1782_v17, 0 }
 0x1ff   : > { %v927_v42 = vmax.f32 %v845_v38, 0.0 }
 0x200   : > { %v925_v44 = vmax.f32 %v837_v40, 0.0 }
 0x201   : > { %v1798_v45 = vpack.c.bf16 %v927_v42, %v926_v41 }
 0x202   : > { %v1800_v46 = vpack.c.bf16 %v925_v44, %v924_v43  ;;  %v1371_v47 = vpop.f32.mrb[16].mxu1 }
 0x203   : > { %v858_v48 = vadd.f32 %v1371_v47, %v1768_v1  ;;  %v849_v49 = vpop.f32.mrb[17].mxu1  ;;  %v987_v17 = vsel %vm961_vm4, %v1798_v45, 0 }
 0x204   : > { %v850_v50 = vadd.f32 %v1768_v1, %v849_v49  ;;  %v1372_v52 = vpop.f32.mrb[18].mxu1 }
 0x205   : > { %v861_v53 = vadd.f32 %v1372_v52, %v1768_v1  ;;  %v852_v54 = vpop.f32.mrb[19].mxu1  ;;  %v930_v56 = vmax.f32 %v858_v48, 0.0  ;;  %v981_v52 = vsel %vm961_vm4, %v1790_v31, 0  ;;  %v1058_v31 = vpop.permute.xlu0 %1057 }
 0x206   : > { %v853_v55 = vadd.f32 %v1768_v1, %v852_v54  ;;  %v928_v58 = vmax.f32 %v850_v50, 0.0  ;;  %v978_v50 = vsel %vm961_vm4, %v1792_v32, 0  ;;  %v1060_v32 = vlaneseq }
 0x207   : > { %v931_v57 = vmax.f32 %v861_v53, 0.0 }
 0x208   : > { %v929_v59 = vmax.f32 %v853_v55, 0.0  ;;  %v1061_v53 = vshrl.u32 %v1060_v32, 7  ;;  %vm1098_vm5 = vcmp.lt.s32.totalorder %v1060_v32, 256 }
 0x209   : > { %v953_v60 = vpack.c.bf16 %v931_v57, %v930_v56 }
 0x20a   : > { %v952_v61 = vpack.c.bf16 %v929_v59, %v928_v58  ;;  %v1375_v62 = vpop.f32.mrb[20].mxu1  ;;  %v1062_v54 = vsub.s32 0, %v1061_v53 }
 0x20b   : > { %v874_v63 = vadd.f32 %v1375_v62, %v1768_v1  ;;  %v865_v0 = vpop.f32.mrb[21].mxu1 }
 0x20c   : > { %v866_v2 = vadd.f32 %v1768_v1, %v865_v0  ;;  %1385 = vmatprep.subr.msk.bf16.mxu1 %vm961_vm4, %v952_v61  ;;  %v1376_v5 = vpop.f32.mrb[22].mxu1  ;;  %v1063_v55 = vrot.slane %v1058_v31, %v1062_v54 }
 0x20d   : > { %v934_v7 = vmax.f32 %v874_v63, 0.0  ;;  %v877_v8 = vadd.f32 %v1376_v5, %v1768_v1  ;;  %1280 = vmatpush3.bf16.xpose.msra.mxu1 %v966_v6  ;;  %v868_v9 = vpop.f32.mrb[23].mxu1  ;;  %v1522_v6 = vmov 1966171168  }
 0x20e   : > { %v932_v10 = vmax.f32 %v866_v2, 0.0  ;;  %v869_v11 = vadd.f32 %v1768_v1, %v868_v9  ;;  %1386 = vmatprep.subr.msk.bf16.mxu1 %vm961_vm4, %v953_v60 }
 0x20f   : > { %v935_v12 = vmax.f32 %v877_v8, 0.0 }
 0x210   : > { %v933_v13 = vmax.f32 %v869_v11, 0.0 }
 0x211   : > { %v955_v14 = vpack.c.bf16 %v935_v12, %v934_v7  ;;  %v1082_v7 = vunpack.c.l.s4 %v1522_v6 }
 0x212   : > { %v954_v15 = vpack.c.bf16 %v933_v13, %v932_v10  ;;  %v1379_v16 = vpop.f32.mrb[24].mxu1 }
 0x213   : > { %v890_v19 = vadd.f32 %v1379_v16, %v1768_v1  ;;  %v881_v20 = vpop.f32.mrb[25].mxu1  ;;  %v1083_v8 = vunpack.c.0.s8 %v1082_v7 }
 0x214   : > { %v882_v21 = vadd.f32 %v1768_v1, %v881_v20  ;;  %v1380_v22 = vpop.f32.mrb[26].mxu1 }
 0x215   : > { %1282 = vmatpush3.bf16.xpose.msra.mxu1 %v969_v4  ;;  %v938_v23 = vmax.f32 %v890_v19, 0.0  ;;  %v893_v24 = vadd.f32 %v1380_v22, %v1768_v1  ;;  %v884_v25 = vpop.f32.mrb[27].mxu1  ;;  %v1086_v10 = vsub.s32 %v1083_v8, %v1061_v53 }
 0x216   : > { %1387 = vmatprep.subr.msk.bf16.mxu1 %vm961_vm4, %v954_v15  ;;  %v936_v26 = vmax.f32 %v882_v21, 0.0  ;;  %v885_v27 = vadd.f32 %v1768_v1, %v884_v25 }
 0x217   : > { %v939_v28 = vmax.f32 %v893_v24, 0.0 }
 0x218   : > { %v937_v29 = vmax.f32 %v885_v27, 0.0 }
 0x219   : > { %v957_v30 = vpack.c.bf16 %v939_v28, %v938_v23 }
 0x21a   : > { %v956_v33 = vpack.c.bf16 %v937_v29, %v936_v26  ;;  %v1383_v34 = vpop.f32.mrb[28].mxu1 }
 0x21b   : > { %v906_v3 = vadd.f32 %v1383_v34, %v1768_v1  ;;  %v897_v35 = vpop.f32.mrb[29].mxu1 }
 0x21c   : > { %v898_v37 = vadd.f32 %v1768_v1, %v897_v35  ;;  %v1384_v38 = vpop.f32.mrb[30].mxu1 }
 0x21d   : > { %1284 = vmatpush3.bf16.xpose.msra.mxu1 %v972_v36  ;;  %v942_v39 = vmax.f32 %v906_v3, 0.0  ;;  %v909_v40 = vadd.f32 %v1384_v38, %v1768_v1  ;;  %v900_v41 = vpop.f32.mrb[31].mxu1 }
 0x21e   : > { %1388 = vmatprep.subr.msk.bf16.mxu1 %vm961_vm4, %v955_v14  ;;  %v940_v42 = vmax.f32 %v898_v37, 0.0  ;;  %v901_v43 = vadd.f32 %v1768_v1, %v900_v41  ;;  %v984_v1 = vsel %vm961_vm4, %v1800_v46, 0 }
 0x21f   : > { %v943_v44 = vmax.f32 %v909_v40, 0.0 }
 0x220   : > { %v941_v47 = vmax.f32 %v901_v43, 0.0 }
 0x221   : > { %v959_v48 = vpack.c.bf16 %v943_v44, %v942_v39 }
 0x222   : > { %v958_v49 = vpack.c.bf16 %v941_v47, %v940_v42 }
 0x225   : > { %1286 = vmatpush3.bf16.xpose.msra.mxu1 %v975_v18 }
 0x226   : > { %1389 = vmatprep.subr.msk.bf16.mxu1 %vm961_vm4, %v956_v33 }
 0x22d   : > { %1288 = vmatpush3.bf16.xpose.msra.mxu1 %v978_v50 }
 0x22e   : > { %1390 = vmatprep.subr.msk.bf16.mxu1 %vm961_vm4, %v957_v30 }
 0x235   : > { %1290 = vmatpush3.bf16.xpose.msra.mxu1 %v981_v52 }
 0x236   : > { %1391 = vmatprep.subr.msk.bf16.mxu1 %vm961_vm4, %v958_v49 }
 0x23d   : > { %1292 = vmatpush3.bf16.xpose.msra.mxu1 %v984_v1 }
 0x23e   : > { %1392 = vmatprep.subr.msk.bf16.mxu1 %vm961_vm4, %v959_v48 }
 0x245   : > { %1294 = vmatpush3.bf16.xpose.msra.mxu1 %v987_v17 }
 0x24c   : > { %1296 = vmatmul.mubr.msk.bf16.vlgmr.msra.gmra.mrb[32].mxu1 %vm961_vm4, %v1761_v51 }
 0x31f   : > { %v1047_v56 = vpop.f32.mrb[32].mxu1 }
 0x320   : > { %v1064_v57 = vadd.f32 %v1063_v55, %v1047_v56  ;;  %v1049_v58 = vpop.f32.mrb[33].mxu1 }
 0x321   : > { %v1065_v59 = vadd.f32 %v1063_v55, %v1049_v58  ;;  %v1051_v46 = vpop.f32.mrb[34].mxu1 }
 0x322   : > { %v1066_v60 = vsub.f32 0.0, %v1064_v57  ;;  %v1052_v61 = vpop.f32.mrb[35].mxu1 }
 0x323   : > { %v1067_v62 = vsub.f32 0.0, %v1065_v59 }
 0x324   : > { %v1068_v63 = vmul.f32 1.442695, %v1066_v60 }
 0x325   : > { %v1070_v45 = vmul.f32 1.442695, %v1067_v62 }
 0x326   : > { %1448 = vpow2.f32 %v1068_v63 }
 0x327   : > { %1450 = vpow2.f32 %v1070_v45 }
 0x330   : > { %v1449_v0 = vpop.eup %1448 }
 0x331   : > { %v1451_v51 = vpop.eup %1450  ;;  %v1072_v2 = vadd.f32 1.0, %v1449_v0 }
 0x332   : > { %v1073_v5 = vadd.f32 1.0, %v1451_v51 }
 0x333   : > { %1452 = vrcp.f32 %v1072_v2 }
 0x334   : > { %1454 = vrcp.f32 %v1073_v5 }
 0x33d   : > { %v1453_v9 = vpop.eup %1452 }
 0x33e   : > { %v1455_v11 = vpop.eup %1454 }
 0x33f   : > { %v1080_v12 = vcombine.low %v1453_v9, %v1455_v11 }
 0x341   : > { %v1087_v13 = vrot.slane %v1080_v12, %v1086_v10 }
 0x343   : > { %v1094_v14 = vrot.slane %v1087_v13, %v1086_v10 }
 0x345   : > { %1100 = vst.msk [vmem:[%s274_s22] sm:$0x3] %vm1098_vm5, %v1094_v14 }
 0x346   : > { %1469 = shalt.err (!%p1466_p3)
}
 0x347   : > { %s1470_s20 = scalar_lea.hbm %s1849_s30, 32  ;;  %s1474_s18 = scalar_lea.hbm %s1898_s7, 64 }
 0x348   : > { %p1471_p4 = scmp.ne.s32.totalorder %s1849_s30, %s1470_s20  ;;  %p1475_p9 = scmp.lt.u32.totalorder %s1849_s30, %s1898_s7 }
 0x349   : > { %p1476_p10 = scmp.lt.u32.totalorder %s1474_s18, %s1470_s20  ;;  %p1478_p12 = scmp.lt.u32.totalorder %s1470_s20, %s1849_s30 }
 0x34a   : > { %p1472_p7 = pnand %p1471_p4, %p1602_p5 }
 0x34b   : > { %p1477_p11 = por %p1476_p10, %p1475_p9 }
 0x34c   : > { %p1473_p8 = pneg %p1472_p7 }
 0x34d   : > { %p1479_p13 = por %p1478_p12, %p1477_p11 }
 0x34f   : > { %p1480_p0 = pnand %p1479_p13, %p1473_p8 }
 0x351   : > { %1483 = shalt.err (!%p1480_p0)
}
 0x352   : > { %1393 = dma.vmem_to_hbm [thread:$0]  (%p1602_p5), %s1851_s23, 32, %s1849_s30, %s1102_s9  }
 0x353 PF: > { %p1399_p1 = scmp.ge.s32.totalorder %s1518_s29, 2  ;;  %s1128_s22 = sand.u32 1, %s1506_s26  }
 0x354   : > { %s1129_s24 = scalar_lea.sflag [#allocation4], %s1128_s22 }
 0x355   : > { %p1396_p2 = pnand %p1399_p1, %p1606_p6 }
 0x357   : > { %1501 = dma.done.wait (!%p1396_p2), %s1129_s24, 32  }
 0x358   : > { %1503 = vsyncadd (!%p1396_p2), %s1129_s24, 4294967264  ;;  %p19_p3 = scmp.ge.s32.totalorder %s1590_s8, 4   ;;  %s1901_s26 = smov %s1510_s27 }
 0x359   : > { %s1902_s27 = smov %s1514_s28  ;;  %s1903_s28 = smov %s1600_s11 }
 0x35a   : > { %s1904_s29 = smov %s1590_s8  ;;  %21 = sbr.rel (!%p19_p3) target bundleno = 6 (0x6), region = 83 }
 0x361   :  { %1134 = vsyncpa [#allocation4], 1 }
 0x362   :  { %1136 = vsyncpa [#allocation4 + $0x1], 1 }

</bundles_post_ra>
